<compile_context>
chip_gen: v7x
topology: tpu7x:2x2x1
jax: 0.10.0
libtpu: 0.0.40
codegen_flags: <defaults>
</compile_context>

<pallas_src>
import jax
import jax.numpy as jnp
from jax.experimental import pallas as pl
from jax.experimental.pallas import tpu as pltpu

_INV_SQRT2 = 0.7071067811865476

# Abramowitz & Stegun 7.1.26 erf coefficients (max abs error ~1.5e-7).
_P = 0.3275911
_A1 = 0.254829592
_A2 = -0.284496736
_A3 = 1.421413741
_A4 = -1.453152027
_A5 = 1.061405429


def gelu_kernel(x_ref, o_ref):
    x = x_ref[...].astype(jnp.float32)

    # exact GELU: 0.5 * x * (1 + erf(x / sqrt(2)))
    z = jnp.abs(x) * _INV_SQRT2
    t = 1.0 / (1.0 + _P * z)
    poly = t * (_A1 + t * (_A2 + t * (_A3 + t * (_A4 + t * _A5))))
    erf_abs = 1.0 - poly * jnp.exp(-z * z)          # erf(|x|/sqrt(2)), in [0, 1)
    erf = jnp.where(x < 0.0, -erf_abs, erf_abs)

    o_ref[...] = (0.5 * x * (1.0 + erf)).astype(o_ref.dtype)


def gelu(x, *, row_tile=1024, lane=128):
    """Elementwise exact GELU for an arbitrarily-shaped array."""
    orig_shape = x.shape
    dtype = x.dtype
    total = x.size

    # Repack to a lane-dense (rows, 128) layout; pad rows so the row tile
    # (a multiple of 8) divides them evenly.
    nrows = -(-total // lane)                         # cdiv
    min_rows = ((nrows + 7) // 8) * 8                 # round up to sublane mult.
    tm = min(row_tile, min_rows)                      # small inputs -> one tile
    nrows_padded = ((nrows + tm - 1) // tm) * tm
    padded_total = nrows_padded * lane

    flat = jnp.ravel(x)
    if padded_total != total:
        flat = jnp.pad(flat, (0, padded_total - total))
    x2 = flat.reshape(nrows_padded, lane)

    grid = (nrows_padded // tm,)
    itemsize = jnp.dtype(dtype).itemsize

    out = pl.pallas_call(
        gelu_kernel,
        out_shape=jax.ShapeDtypeStruct((nrows_padded, lane), dtype),
        grid_spec=pltpu.PrefetchScalarGridSpec(
            num_scalar_prefetch=0,
            grid=grid,
            in_specs=[pl.BlockSpec((tm, lane), lambda i: (i, 0))],
            out_specs=pl.BlockSpec((tm, lane), lambda i: (i, 0)),
        ),
        compiler_params=pltpu.CompilerParams(
            dimension_semantics=("parallel",)),      # rows independent; both TCs on v7x
        cost_estimate=pl.CostEstimate(
            flops=20 * padded_total,
            transcendentals=padded_total,            # one exp per element
            bytes_accessed=2 * padded_total * itemsize,
        ),
    )(x2)

    out_flat = out.reshape(-1)
    if padded_total != total:
        out_flat = out_flat[:total]
    return out_flat.reshape(orig_shape)


if __name__ == "__main__":
    key = jax.random.PRNGKey(0)
    x = jax.random.normal(key, (2, 4, 16, 16), dtype=jnp.float32)

    out = jax.block_until_ready(gelu(x))

    ref = jax.nn.gelu(x.astype(jnp.float32), approximate=False)
    assert out.shape == x.shape
    max_err = jnp.max(jnp.abs(out - ref))
    assert jnp.allclose(out, ref, atol=1e-4, rtol=1e-4), f"max err {max_err}"

    print("KERNEL_OK")
</pallas_src>

<mosaic_0001>
module attributes {stable_mosaic.version = 11 : i64} {
  func.func @gelu_kernel(%arg0: i32, %arg1: memref<16x128xf32, #tpu.memory_space<vmem>>, %arg2: memref<16x128xf32, #tpu.memory_space<vmem>>) attributes {dimension_semantics = [#tpu.dimension_semantics<parallel>], iteration_bounds = array<i64: 1>, scalar_prefetch = 0 : i64, scratch_operands = 0 : i64, tpu.core_type = #tpu.core_type<tc>, window_params = [{transform_indices = @transform_0, window_bounds = array<i64: 16, 128>}, {transform_indices = @transform_1, window_bounds = array<i64: 16, 128>}]} {
    %c0 = arith.constant 0 : index
    %c0_0 = arith.constant 0 : index
    %0 = vector.load %arg1[%c0, %c0_0] : memref<16x128xf32, #tpu.memory_space<vmem>>, vector<16x128xf32>
    %1 = math.absf %0 : vector<16x128xf32>
    %cst = arith.constant 0.707106769 : f32
    %2 = vector.broadcast %cst : f32 to vector<16x128xf32>
    %3 = arith.mulf %1, %2 : vector<16x128xf32>
    %cst_1 = arith.constant 0.327591091 : f32
    %4 = vector.broadcast %cst_1 : f32 to vector<16x128xf32>
    %5 = arith.mulf %4, %3 : vector<16x128xf32>
    %cst_2 = arith.constant 1.000000e+00 : f32
    %6 = vector.broadcast %cst_2 : f32 to vector<16x128xf32>
    %7 = arith.addf %6, %5 : vector<16x128xf32>
    %cst_3 = arith.constant 1.000000e+00 : f32
    %8 = vector.broadcast %cst_3 : f32 to vector<16x128xf32>
    %9 = arith.divf %8, %7 : vector<16x128xf32>
    %cst_4 = arith.constant 1.06140542 : f32
    %10 = vector.broadcast %cst_4 : f32 to vector<16x128xf32>
    %11 = arith.mulf %9, %10 : vector<16x128xf32>
    %cst_5 = arith.constant -1.45315206 : f32
    %12 = vector.broadcast %cst_5 : f32 to vector<16x128xf32>
    %13 = arith.addf %12, %11 : vector<16x128xf32>
    %14 = arith.mulf %9, %13 : vector<16x128xf32>
    %cst_6 = arith.constant 1.42141378 : f32
    %15 = vector.broadcast %cst_6 : f32 to vector<16x128xf32>
    %16 = arith.addf %15, %14 : vector<16x128xf32>
    %17 = arith.mulf %9, %16 : vector<16x128xf32>
    %cst_7 = arith.constant -0.284496725 : f32
    %18 = vector.broadcast %cst_7 : f32 to vector<16x128xf32>
    %19 = arith.addf %18, %17 : vector<16x128xf32>
    %20 = arith.mulf %9, %19 : vector<16x128xf32>
    %cst_8 = arith.constant 0.254829586 : f32
    %21 = vector.broadcast %cst_8 : f32 to vector<16x128xf32>
    %22 = arith.addf %21, %20 : vector<16x128xf32>
    %23 = arith.mulf %9, %22 : vector<16x128xf32>
    %cst_9 = arith.constant 0.000000e+00 : f32
    %24 = vector.broadcast %cst_9 : f32 to vector<16x128xf32>
    %25 = arith.subf %24, %3 : vector<16x128xf32>
    %26 = arith.mulf %25, %3 : vector<16x128xf32>
    %27 = math.exp %26 : vector<16x128xf32>
    %28 = arith.mulf %23, %27 : vector<16x128xf32>
    %cst_10 = arith.constant 1.000000e+00 : f32
    %29 = vector.broadcast %cst_10 : f32 to vector<16x128xf32>
    %30 = arith.subf %29, %28 : vector<16x128xf32>
    %cst_11 = arith.constant 0.000000e+00 : f32
    %31 = vector.broadcast %cst_11 : f32 to vector<16x128xf32>
    %32 = arith.cmpf olt, %0, %31 : vector<16x128xf32>
    %cst_12 = arith.constant 0.000000e+00 : f32
    %33 = vector.broadcast %cst_12 : f32 to vector<16x128xf32>
    %34 = arith.subf %33, %30 : vector<16x128xf32>
    %35 = arith.select %32, %34, %30 : vector<16x128xi1>, vector<16x128xf32>
    %cst_13 = arith.constant 5.000000e-01 : f32
    %36 = vector.broadcast %cst_13 : f32 to vector<16x128xf32>
    %37 = arith.mulf %36, %0 : vector<16x128xf32>
    %cst_14 = arith.constant 1.000000e+00 : f32
    %38 = vector.broadcast %cst_14 : f32 to vector<16x128xf32>
    %39 = arith.addf %38, %35 : vector<16x128xf32>
    %40 = arith.mulf %37, %39 : vector<16x128xf32>
    %c0_15 = arith.constant 0 : index
    %c0_16 = arith.constant 0 : index
    %41 = vector.load %arg2[%c0_15, %c0_16] : memref<16x128xf32, #tpu.memory_space<vmem>>, vector<16x128xf32>
    tpu.vector_store %arg2[%c0_15, %c0_16], %40 {strides = array<i32>} : memref<16x128xf32, #tpu.memory_space<vmem>>, vector<16x128xf32>,
    return
  }
  func.func @transform_0(%arg0: i32) -> (i32, i32) {
    %c0_i32 = arith.constant 0 : i32
    %c0_i32_0 = arith.constant 0 : i32
    return %arg0, %c0_i32 : i32, i32
  }
  func.func @transform_1(%arg0: i32) -> (i32, i32) {
    %c0_i32 = arith.constant 0 : i32
    %c0_i32_0 = arith.constant 0 : i32
    return %arg0, %c0_i32 : i32, i32
  }
}

</mosaic_0001>

<bundles_post_ra>
// kernel: tpu_custom_call.1
= control target key start
LH: loop header
LB: loop body
LE: loop exit
PB: predicated region body
PF: predicated region fallthrough
CT: control target
= control target key end

     0   :  { %6 = vsyncpa [#allocation3], 0  ;;  %s202_s0 = inlined_call_operand.hbm [shape: f32[16,128], index: 0, kind: input, shape index: {}]   ;;  %s203_s1 = inlined_call_operand.hbm [shape: f32[16,128], index: 1, kind: output, shape index: {}]  }
   0x1   :  { %7 = vsyncpa [#allocation4], 0  ;;  %s158_s6 = smov [#allocation2]   ;;  %s110_s10 = scalar_lea.hbm %s202_s0, 256 }
   0x2   :  { %s13_s7 = sshll.u32 %s158_s6, 4  ;;  %p111_p0 = scmp.ne.s32.totalorder %s202_s0, %s110_s10  ;;  %s14_s7 = int_to_ptr.vmem [resolvable:$true] %s13_s7 }
   0x3   :  { %p114_p1 = scmp.lt.u32.totalorder %s110_s10, %s202_s0 }
   0x5   :  { %p116_p2 = pnand %p114_p1, %p111_p0 }
   0x7   :  { %119 = shalt.err (!%p116_p2)
}
   0x8   :  { %s120_s15 = scalar_lea.vmem %s14_s7, 256  ;;  %p125_p4 = scmp.lt.s32.totalorder %s14_s7, %s14_s7 }
   0x9   :  { %p121_p3 = scmp.ne.s32.totalorder %s14_s7, %s120_s15  ;;  %p126_p5 = scmp.lt.s32.totalorder %s120_s15, %s120_s15 }
   0xb   :  { %p127_p6 = por %p126_p5, %p125_p4 }
   0xd   :  { %p128_p7 = pnand %p127_p6, %p121_p3 }
   0xf   :  { %131 = shalt.err (!%p128_p7)
}
  0x10   :  { %s159_s16 = smov 128   ;;  %s160_s17 = smov 8  }
  0x11   :  { %19 = dma.hbm_to_vmem [thread:$0]  %s202_s0, 256, %s14_s7, [#allocation3], %s159_s16, %s159_s16, %s160_s17  }
  0x12   :  { %154 = dma.done.wait [#allocation3], 256  }
  0x13   :  { %155 = vsyncadd [#allocation3], 4294967040  ;;  %v23_v0 = vld [vmem:[#allocation2] sm:$0xff]  ;;  %v24_v1 = vld [vmem:[#allocation2 + $0x8] sm:$0xff]  ;;  %s161_s0 = smov [#allocation5]  }
  0x14   :  { %v25_v2 = vand.u32 2147483647, %v23_v0  ;;  %v26_v3 = vand.u32 2147483647, %v24_v1  ;;  %vm67_vm0 = vcmp.lt.f32.partialorder %v23_v0, 0.0  ;;  %vm68_vm1 = vcmp.lt.f32.partialorder %v24_v1, 0.0 }
  0x15   :  { %v73_v43 = vmul.f32 0.5, %v23_v0  ;;  %v74_v46 = vmul.f32 0.5, %v24_v1  ;;  %s86_s20 = sshll.u32 %s161_s0, 4  ;;  %s87_s20 = int_to_ptr.vmem [resolvable:$true] %s86_s20 }
  0x16   :  { %v27_v4 = vmul.f32 0.70710677, %v25_v2  ;;  %v28_v5 = vmul.f32 0.70710677, %v26_v3  ;;  %s132_s21 = scalar_lea.vmem %s87_s20, 256  ;;  %p137_p9 = scmp.lt.s32.totalorder %s87_s20, %s87_s20 }
  0x17   :  { %p133_p8 = scmp.ne.s32.totalorder %s87_s20, %s132_s21  ;;  %p138_p10 = scmp.lt.s32.totalorder %s132_s21, %s132_s21 }
  0x18   :  { %v29_v6 = vmul.f32 0.3275911, %v27_v4  ;;  %v30_v7 = vmul.f32 0.3275911, %v28_v5  ;;  %v55_v10 = vsub.f32 0.0, %v27_v4  ;;  %v56_v11 = vsub.f32 0.0, %v28_v5 }
  0x19   :  { %p139_p11 = por %p138_p10, %p137_p9 }
  0x1a   :  { %v31_v8 = vadd.f32 1.0, %v29_v6  ;;  %v32_v9 = vadd.f32 1.0, %v30_v7  ;;  %v57_v12 = vmul.f32 %v55_v10, %v27_v4  ;;  %v58_v13 = vmul.f32 %v56_v11, %v28_v5 }
  0x1b   :  { %p140_p12 = pnand %p139_p11, %p133_p8 }
  0x1c   :  { %102 = vrcp.f32 %v31_v8  ;;  %v59_v17 = vmul.f32 1.442695, %v57_v12  ;;  %v61_v20 = vmul.f32 1.442695, %v58_v13 }
  0x1d   :  { %104 = vrcp.f32 %v32_v9 }
  0x1e   :  { %106 = vpow2.f32 %v59_v17 }
  0x1f   :  { %108 = vpow2.f32 %v61_v20 }
  0x26   :  { %v103_v14 = vpop.eup %102 }
  0x27   :  { %v105_v15 = vpop.eup %104  ;;  %v37_v16 = vmul.f32 1.0614054, %v103_v14 }
  0x28   :  { %v38_v18 = vmul.f32 1.0614054, %v105_v15  ;;  %v107_v33 = vpop.eup %106 }
  0x29   :  { %v39_v19 = vadd.f32 -1.4531521, %v37_v16  ;;  %v109_v35 = vpop.eup %108 }
  0x2a   :  { %v40_v21 = vadd.f32 -1.4531521, %v38_v18 }
  0x2b   :  { %v41_v22 = vmul.f32 %v103_v14, %v39_v19 }
  0x2c   :  { %v42_v23 = vmul.f32 %v105_v15, %v40_v21 }
  0x2d   :  { %v43_v24 = vadd.f32 1.4214138, %v41_v22 }
  0x2e   :  { %v44_v25 = vadd.f32 1.4214138, %v42_v23 }
  0x2f   :  { %v45_v26 = vmul.f32 %v103_v14, %v43_v24 }
  0x30   :  { %v46_v27 = vmul.f32 %v105_v15, %v44_v25 }
  0x31   :  { %v47_v28 = vadd.f32 -0.28449672, %v45_v26 }
  0x32   :  { %v48_v29 = vadd.f32 -0.28449672, %v46_v27 }
  0x33   :  { %v49_v30 = vmul.f32 %v103_v14, %v47_v28 }
  0x34   :  { %v50_v31 = vmul.f32 %v105_v15, %v48_v29 }
  0x35   :  { %v51_v32 = vadd.f32 0.2548296, %v49_v30 }
  0x36   :  { %v52_v34 = vadd.f32 0.2548296, %v50_v31 }
  0x37   :  { %v53_v36 = vmul.f32 %v103_v14, %v51_v32 }
  0x38   :  { %v54_v37 = vmul.f32 %v105_v15, %v52_v34 }
  0x39   :  { %v63_v38 = vmul.f32 %v107_v33, %v53_v36 }
  0x3a   :  { %v64_v39 = vmul.f32 %v109_v35, %v54_v37 }
  0x3b   :  { %v65_v40 = vsub.f32 1.0, %v63_v38 }
  0x3c   :  { %v66_v41 = vsub.f32 1.0, %v64_v39 }
  0x3d   :  { %v69_v42 = vsub.f32 0.0, %v65_v40 }
  0x3e   :  { %v70_v44 = vsub.f32 0.0, %v66_v41 }
  0x3f   :  { %v71_v45 = vsel %vm67_vm0, %v69_v42, %v65_v40 }
  0x40   :  { %v75_v47 = vadd.f32 1.0, %v71_v45  ;;  %v72_v48 = vsel %vm68_vm1, %v70_v44, %v66_v41 }
  0x41   :  { %v76_v49 = vadd.f32 1.0, %v72_v48 }
  0x42   :  { %v77_v50 = vmul.f32 %v75_v47, %v73_v43 }
  0x43   :  { %v78_v51 = vmul.f32 %v76_v49, %v74_v46 }
  0x44   :  { %79 = vst [vmem:[#allocation5] sm:$0xff] %v77_v50 }
  0x45   :  { %80 = vst [vmem:[#allocation5 + $0x8] sm:$0xff] %v78_v51 }
  0x46   :  { %143 = shalt.err (!%p140_p12)
}
  0x47   :  { %s144_s24 = scalar_lea.hbm %s203_s1, 256 }
  0x48   :  { %p145_p13 = scmp.ne.s32.totalorder %s203_s1, %s144_s24  ;;  %p148_p0 = scmp.lt.u32.totalorder %s144_s24, %s203_s1 }
  0x4a   :  { %p150_p1 = pnand %p148_p0, %p145_p13 }
  0x4c   :  { %153 = shalt.err (!%p150_p1)
}
  0x4d   :  { %92 = dma.vmem_to_hbm [thread:$0]  %s87_s20, 256, %s203_s1, [#allocation4], %s159_s16, %s159_s16, %s160_s17  }
  0x4e   :  { %156 = dma.done.wait [#allocation4], 256  }
  0x4f   :  { %157 = vsyncadd [#allocation4], 4294967040 }
  0x50   :  { %96 = vsyncpa [#allocation3], 1 }
  0x51   :  { %97 = vsyncpa [#allocation4], 1 }

</bundles_post_ra>
